<compile_context>
chip_gen: v7x
topology: tpu7x:2x2x1
jax: 0.10.0
libtpu: 0.0.40
codegen_flags: <defaults>
</compile_context>

<pallas_src>
import functools
import numpy as np
import jax
import jax.numpy as jnp
from jax import lax
from jax.experimental import pallas as pl
from jax.experimental.pallas import tpu as pltpu

_VMEM_LIMIT = 32 * 1024 * 1024   # safe on v5e/v6e/v7x; fits 4 MiB double-buffered tiles


# ----------------------------------------------------------------------------
# helpers
# ----------------------------------------------------------------------------
def _pick_tile_rows(bytes_per_row, n, target_bytes=8 << 20, max_rows=16384):
    """Row-tile size: ~target_bytes of per-row working set, multiple of 8."""
    rows = max(8, min(max_rows, target_bytes // max(int(bytes_per_row), 1)))
    rows = int(rows) // 8 * 8
    if n <= rows:
        return n              # one full-extent tile (legal even if n % 8 != 0)
    return rows


def _param2d(v, d):
    return v.reshape(1, d).astype(jnp.float32)


def _split_grid(n, tile_n):
    """(num_tiles, cores, inner) for the 2-way core-split reduction grid."""
    t = pl.cdiv(n, tile_n)
    cores = 2 if t >= 2 else 1
    inner = pl.cdiv(t, cores)
    return t, cores, inner


def _make_row_map(inner, t):
    # Clamp the nominal tile index so the (rare) dangling tile of an odd split
    # re-reads a valid tile; the kernel masks it out by global row index.
    def row_map(c, i):
        return (jnp.minimum(c * inner + i, t - 1), 0)
    return row_map


# ----------------------------------------------------------------------------
# GraphNorm ('graphnorm' branch): two row-tiled passes.
# ----------------------------------------------------------------------------
def _graph_stats_kernel(seg_ref, x_ref, sum_out, sq_out, sum_acc, sq_acc, *, n_rows):
    """Per-graph column sum / sum-of-squares via one-hot (MXU) segment reduce."""
    c = pl.program_id(0)
    i = pl.program_id(1)
    n_inner = pl.num_programs(1)

    @pl.when(i == 0)
    def _():
        sum_acc[...] = jnp.zeros_like(sum_acc)
        sq_acc[...] = jnp.zeros_like(sq_acc)

    rows = x_ref.shape[0]
    bsz = sum_acc.shape[0]
    row0 = (c * n_inner + i) * rows                       # nominal global row start
    local = lax.broadcasted_iota(jnp.int32, (rows, 1), 0)
    valid = (row0 + local) < n_rows                       # masks ragged / clamped tiles
    x = jnp.where(valid, x_ref[...].astype(jnp.float32), 0.0)
    seg = seg_ref[...]                                    # (rows, 1) int32
    gid = lax.broadcasted_iota(jnp.int32, (rows, bsz), 1)
    onehot = (gid == seg).astype(jnp.float32)             # (rows, bsz)
    dn = (((0,), (0,)), ((), ()))                         # contract over rows
    sum_acc[...] += lax.dot_general(onehot, x, dn, preferred_element_type=jnp.float32)
    sq_acc[...] += lax.dot_general(onehot, x * x, dn, preferred_element_type=jnp.float32)

    @pl.when(i == n_inner - 1)
    def _():
        sum_out[0] = sum_acc[...]
        sq_out[0] = sq_acc[...]


def _graph_apply_kernel(seg_ref, x_ref, scale_ref, shift_ref, o_ref):
    """y = x * scale[seg] + shift[seg]; per-graph params gathered via one-hot matmul."""
    x = x_ref[...].astype(jnp.float32)
    seg = seg_ref[...]
    rows = x.shape[0]
    bsz = scale_ref.shape[0]
    gid = lax.broadcasted_iota(jnp.int32, (rows, bsz), 1)
    onehot = (gid == seg).astype(jnp.float32)
    scale = jnp.dot(onehot, scale_ref[...], preferred_element_type=jnp.float32)
    shift = jnp.dot(onehot, shift_ref[...], preferred_element_type=jnp.float32)
    o_ref[...] = (x * scale + shift).astype(o_ref.dtype)


def graphnorm_pallas(x, batch_num_nodes, weight, bias, mean_scale, eps=1e-6):
    n, d = x.shape
    counts_np = np.asarray(batch_num_nodes, dtype=np.int64)
    assert int(counts_np.sum()) == n, "sum(batch_num_nodes) must equal num_nodes"
    bsz = int(counts_np.shape[0])

    # per-row graph id (host-side; batch_num_nodes is a Python list)
    seg_np = np.repeat(np.arange(bsz, dtype=np.int32), counts_np)
    seg = jnp.asarray(seg_np).reshape(n, 1)

    w = _param2d(weight, d)
    b = _param2d(bias, d)
    ms = _param2d(mean_scale, d)

    tile_n = _pick_tile_rows(4 * (4 * d + 2 * bsz), n)
    t, cores, inner = _split_grid(n, tile_n)
    row_map = _make_row_map(inner, t)

    # ---- pass 1: per-graph sum / sum-of-squares (per-core partials) ----
    sums_p, sqs_p = pl.pallas_call(
        functools.partial(_graph_stats_kernel, n_rows=n),
        out_shape=(jax.ShapeDtypeStruct((cores, bsz, d), jnp.float32),
                   jax.ShapeDtypeStruct((cores, bsz, d), jnp.float32)),
        grid=(cores, inner),
        in_specs=[pl.BlockSpec((tile_n, 1), row_map),
                  pl.BlockSpec((tile_n, d), row_map)],
        out_specs=(pl.BlockSpec((1, bsz, d), lambda c, i: (c, 0, 0)),
                   pl.BlockSpec((1, bsz, d), lambda c, i: (c, 0, 0))),
        scratch_shapes=[pltpu.VMEM((bsz, d), jnp.float32),
                        pltpu.VMEM((bsz, d), jnp.float32)],
        compiler_params=pltpu.CompilerParams(
            dimension_semantics=("parallel", "arbitrary"),
            vmem_limit_bytes=_VMEM_LIMIT),
    )(seg, x)

    # ---- tiny O(bsz*D) stat finalization (plain JAX) ----
    sums = sums_p.sum(axis=0)
    sqs = sqs_p.sum(axis=0)
    cnt = jnp.asarray(np.maximum(counts_np, 1).astype(np.float32)).reshape(bsz, 1)
    mean = sums / cnt
    ex2 = sqs / cnt
    # E[(x - mean*ms)^2] = E[x^2] - 2*ms*mean^2 + (ms*mean)^2
    var = ex2 - 2.0 * ms * mean * mean + (ms * mean) ** 2
    rstd = lax.rsqrt(var + eps)
    scale = w * rstd                                      # (bsz, d)
    shift = b - w * ms * mean * rstd                      # (bsz, d)

    # ---- pass 2: normalize, each row tile read/written exactly once ----
    out = pl.pallas_call(
        _graph_apply_kernel,
        out_shape=jax.ShapeDtypeStruct((n, d), x.dtype),
        grid=(t,),
        in_specs=[pl.BlockSpec((tile_n, 1), lambda i: (i, 0)),
                  pl.BlockSpec((tile_n, d), lambda i: (i, 0)),
                  pl.BlockSpec((bsz, d), lambda i: (0, 0)),
                  pl.BlockSpec((bsz, d), lambda i: (0, 0))],
        out_specs=pl.BlockSpec((tile_n, d), lambda i: (i, 0)),
        compiler_params=pltpu.CompilerParams(
            dimension_semantics=("parallel",),
            vmem_limit_bytes=_VMEM_LIMIT),
    )(seg, x, scale, shift)
    return out


# ----------------------------------------------------------------------------
# LayerNorm ('layernorm' branch): row-tiled, pipelined, "parallel" axis.
# ----------------------------------------------------------------------------
def _layernorm_kernel(x_ref, w_ref, b_ref, o_ref, *, eps):
    x = x_ref[...].astype(jnp.float32)
    mean = jnp.mean(x, axis=-1, keepdims=True)
    ex2 = jnp.mean(x * x, axis=-1, keepdims=True)
    rstd = lax.rsqrt(ex2 - mean * mean + eps)
    o_ref[...] = ((x - mean) * rstd * w_ref[...] + b_ref[...]).astype(o_ref.dtype)


def layernorm_pallas(x, weight, bias, eps=1e-5):
    n, d = x.shape
    w = _param2d(weight, d)
    b = _param2d(bias, d)
    tile_n = _pick_tile_rows(8 * d, n)
    t = pl.cdiv(n, tile_n)

    out = pl.pallas_call(
        functools.partial(_layernorm_kernel, eps=eps),
        out_shape=jax.ShapeDtypeStruct((n, d), x.dtype),
        grid=(t,),
        in_specs=[pl.BlockSpec((tile_n, d), lambda i: (i, 0)),
                  pl.BlockSpec((1, d), lambda i: (0, 0)),
                  pl.BlockSpec((1, d), lambda i: (0, 0))],
        out_specs=pl.BlockSpec((tile_n, d), lambda i: (i, 0)),
        compiler_params=pltpu.CompilerParams(
            dimension_semantics=("parallel",),
            vmem_limit_bytes=_VMEM_LIMIT),
    )(x, w, b)
    return out


# ----------------------------------------------------------------------------
# BatchNorm1d ('batchnorm' branch), training-mode statistics. Two tiled passes.
# ----------------------------------------------------------------------------
def _colstats_kernel(x_ref, sum_out, sq_out, sum_acc, sq_acc, *, n_rows):
    c = pl.program_id(0)
    i = pl.program_id(1)
    n_inner = pl.num_programs(1)

    @pl.when(i == 0)
    def _():
        sum_acc[...] = jnp.zeros_like(sum_acc)
        sq_acc[...] = jnp.zeros_like(sq_acc)

    rows = x_ref.shape[0]
    row0 = (c * n_inner + i) * rows
    local = lax.broadcasted_iota(jnp.int32, (rows, 1), 0)
    valid = (row0 + local) < n_rows
    x = jnp.where(valid, x_ref[...].astype(jnp.float32), 0.0)
    sum_acc[...] += jnp.sum(x, axis=0, keepdims=True)
    sq_acc[...] += jnp.sum(x * x, axis=0, keepdims=True)

    @pl.when(i == n_inner - 1)
    def _():
        sum_out[0] = sum_acc[...]
        sq_out[0] = sq_acc[...]


def _affine_kernel(x_ref, scale_ref, shift_ref, o_ref):
    x = x_ref[...].astype(jnp.float32)
    o_ref[...] = (x * scale_ref[...] + shift_ref[...]).astype(o_ref.dtype)


def batchnorm_pallas(x, weight, bias, eps=1e-5):
    n, d = x.shape
    w = _param2d(weight, d)
    b = _param2d(bias, d)
    tile_n = _pick_tile_rows(8 * d, n)
    t, cores, inner = _split_grid(n, tile_n)
    row_map = _make_row_map(inner, t)

    # pass 1: column sums / sums of squares (per-core partials)
    csum_p, csq_p = pl.pallas_call(
        functools.partial(_colstats_kernel, n_rows=n),
        out_shape=(jax.ShapeDtypeStruct((cores, 1, d), jnp.float32),
                   jax.ShapeDtypeStruct((cores, 1, d), jnp.float32)),
        grid=(cores, inner),
        in_specs=[pl.BlockSpec((tile_n, d), row_map)],
        out_specs=(pl.BlockSpec((1, 1, d), lambda c, i: (c, 0, 0)),
                   pl.BlockSpec((1, 1, d), lambda c, i: (c, 0, 0))),
        scratch_shapes=[pltpu.VMEM((1, d), jnp.float32),
                        pltpu.VMEM((1, d), jnp.float32)],
        compiler_params=pltpu.CompilerParams(
            dimension_semantics=("parallel", "arbitrary"),
            vmem_limit_bytes=_VMEM_LIMIT),
    )(x)

    colsum = csum_p.sum(axis=0)                           # (1, d)
    colsq = csq_p.sum(axis=0)
    mean = colsum / float(n)
    var = colsq / float(n) - mean * mean                  # biased var (torch training)
    rstd = lax.rsqrt(var + eps)
    scale = w * rstd
    shift = b - mean * scale

    # pass 2: row-tiled affine normalize
    out = pl.pallas_call(
        _affine_kernel,
        out_shape=jax.ShapeDtypeStruct((n, d), x.dtype),
        grid=(t,),
        in_specs=[pl.BlockSpec((tile_n, d), lambda i: (i, 0)),
                  pl.BlockSpec((1, d), lambda i: (0, 0)),
                  pl.BlockSpec((1, d), lambda i: (0, 0))],
        out_specs=pl.BlockSpec((tile_n, d), lambda i: (i, 0)),
        compiler_params=pltpu.CompilerParams(
            dimension_semantics=("parallel",),
            vmem_limit_bytes=_VMEM_LIMIT),
    )(x, scale, shift)
    return out


# ----------------------------------------------------------------------------
# NormLayer wrapper mirroring the PyTorch module (deterministic init).
# ----------------------------------------------------------------------------
class Graph:
    def __init__(self, batch_num_nodes):
        self.batch_num_nodes = list(batch_num_nodes)


class NormLayer:
    def __init__(self, hidden_dim, norm_type):
        self.norm_type = norm_type
        self.hidden_dim = hidden_dim
        if norm_type in ("batchnorm", "layernorm", "graphnorm"):
            self.weight = jnp.ones((hidden_dim,), jnp.float32)
            self.bias = jnp.zeros((hidden_dim,), jnp.float32)
            if norm_type == "graphnorm":
                self.mean_scale = jnp.ones((hidden_dim,), jnp.float32)
        else:
            raise NotImplementedError

    def __call__(self, graph, x):
        if self.norm_type == "batchnorm":
            return batchnorm_pallas(x, self.weight, self.bias)
        if self.norm_type == "layernorm":
            return layernorm_pallas(x, self.weight, self.bias)
        return graphnorm_pallas(x, graph.batch_num_nodes,
                                self.weight, self.bias, self.mean_scale)


# ----------------------------------------------------------------------------
# Pure-JAX references for verification.
# ----------------------------------------------------------------------------
def graphnorm_ref(x, batch_num_nodes, weight, bias, mean_scale):
    counts = np.asarray(batch_num_nodes)
    seg = jnp.asarray(np.repeat(np.arange(len(counts)), counts))
    counts_f = jnp.asarray(np.maximum(counts, 1), jnp.float32)[:, None]
    mean = jax.ops.segment_sum(x, seg, num_segments=len(counts)) / counts_f
    sub = x - mean[seg] * mean_scale
    var = jax.ops.segment_sum(sub ** 2, seg, num_segments=len(counts)) / counts_f
    std = jnp.sqrt(var + 1e-6)[seg]
    return weight * sub / std + bias


def layernorm_ref(x, weight, bias):
    mean = jnp.mean(x, axis=-1, keepdims=True)
    var = jnp.mean((x - mean) ** 2, axis=-1, keepdims=True)
    return (x - mean) / jnp.sqrt(var + 1e-5) * weight + bias


def batchnorm_ref(x, weight, bias):
    mean = jnp.mean(x, axis=0, keepdims=True)
    var = jnp.mean((x - mean) ** 2, axis=0, keepdims=True)
    return (x - mean) / jnp.sqrt(var + 1e-5) * weight + bias


if __name__ == "__main__":
    key = jax.random.PRNGKey(0)
    k1, k2, k3, k4 = jax.random.split(key, 4)
    hidden_dim = 32
    batch_num_nodes = [5, 0, 3]        # includes an empty graph (cnt==0 guard)
    num_nodes = sum(batch_num_nodes)

    x = jax.random.normal(k1, (num_nodes, hidden_dim), dtype=jnp.float32)
    graph = Graph(batch_num_nodes)

    # --- graphnorm (two-pass segment kernel) ---
    gn = NormLayer(hidden_dim, "graphnorm")
    gn.weight = 1.0 + 0.1 * jax.random.normal(k2, (hidden_dim,), jnp.float32)
    gn.bias = 0.1 * jax.random.normal(k3, (hidden_dim,), jnp.float32)
    gn.mean_scale = 1.0 + 0.1 * jax.random.normal(k4, (hidden_dim,), jnp.float32)
    out_gn = jax.block_until_ready(gn(graph, x))
    ref_gn = graphnorm_ref(x, batch_num_nodes, gn.weight, gn.bias, gn.mean_scale)
    assert out_gn.shape == x.shape and out_gn.dtype == x.dtype
    assert jnp.allclose(out_gn, ref_gn, atol=1e-4, rtol=1e-4)

    # --- layernorm branch (row-tiled) ---
    ln = NormLayer(hidden_dim, "layernorm")
    ln.weight = 1.0 + 0.1 * jax.random.normal(k2, (hidden_dim,), jnp.float32)
    ln.bias = 0.1 * jax.random.normal(k3, (hidden_dim,), jnp.float32)
    out_ln = jax.block_until_ready(ln(graph, x))
    assert jnp.allclose(out_ln, layernorm_ref(x, ln.weight, ln.bias),
                        atol=1e-4, rtol=1e-4)

    # --- batchnorm branch (two-pass, training-mode stats) ---
    bn = NormLayer(hidden_dim, "batchnorm")
    bn.weight = 1.0 + 0.1 * jax.random.normal(k2, (hidden_dim,), jnp.float32)
    bn.bias = 0.1 * jax.random.normal(k3, (hidden_dim,), jnp.float32)
    out_bn = jax.block_until_ready(bn(graph, x))
    assert out_bn.shape == x.shape
    assert jnp.allclose(out_bn, batchnorm_ref(x, bn.weight, bn.bias),
                        atol=1e-4, rtol=1e-4)

    print("KERNEL_OK")
</pallas_src>

<mosaic_0001>
module attributes {stable_mosaic.version = 11 : i64} {
  func.func @_graph_stats_kernel(%arg0: i32, %arg1: i32, %arg2: memref<8x1xi32, #tpu.memory_space<vmem>>, %arg3: memref<8x32xf32, #tpu.memory_space<vmem>>, %arg4: memref<1x3x32xf32, #tpu.memory_space<vmem>>, %arg5: memref<1x3x32xf32, #tpu.memory_space<vmem>>, %arg6: memref<3x32xf32, #tpu.memory_space<vmem>>, %arg7: memref<3x32xf32, #tpu.memory_space<vmem>>) attributes {dimension_semantics = [#tpu.dimension_semantics<parallel>, #tpu.dimension_semantics<arbitrary>], iteration_bounds = array<i64: 1, 1>, scalar_prefetch = 0 : i64, scratch_operands = 2 : i64, tpu.core_type = #tpu.core_type<tc>, window_params = [{transform_indices = @transform_0, window_bounds = array<i64: 8, 1>}, {transform_indices = @transform_1, window_bounds = array<i64: 8, 32>}, {transform_indices = @transform_2, window_bounds = array<i64: 1, 3, 32>}, {transform_indices = @transform_3, window_bounds = array<i64: 1, 3, 32>}]} {
    %c0_i32 = arith.constant 0 : i32
    %0 = arith.cmpi eq, %arg1, %c0_i32 : i32
    %1 = arith.extui %0 : i1 to i32
    %c0_i32_0 = arith.constant 0 : i32
    %2 = arith.cmpi ne, %1, %c0_i32_0 : i32
    scf.if %2 {
      %cst_17 = arith.constant 0.000000e+00 : f32
      %34 = vector.broadcast %cst_17 : f32 to vector<3x32xf32>
      %c0_18 = arith.constant 0 : index
      %c0_19 = arith.constant 0 : index
      %35 = vector.load %arg6[%c0_18, %c0_19] : memref<3x32xf32, #tpu.memory_space<vmem>>, vector<3x32xf32>
      tpu.vector_store %arg6[%c0_18, %c0_19], %34 {strides = array<i32>} : memref<3x32xf32, #tpu.memory_space<vmem>>, vector<3x32xf32>,
      %cst_20 = arith.constant 0.000000e+00 : f32
      %36 = vector.broadcast %cst_20 : f32 to vector<3x32xf32>
      %c0_21 = arith.constant 0 : index
      %c0_22 = arith.constant 0 : index
      %37 = vector.load %arg7[%c0_21, %c0_22] : memref<3x32xf32, #tpu.memory_space<vmem>>, vector<3x32xf32>
      tpu.vector_store %arg7[%c0_21, %c0_22], %36 {strides = array<i32>} : memref<3x32xf32, #tpu.memory_space<vmem>>, vector<3x32xf32>,
    } else {
    }
    %c1_i32 = arith.constant 1 : i32
    %3 = arith.muli %arg0, %c1_i32 : i32
    %4 = arith.addi %3, %arg1 : i32
    %c8_i32 = arith.constant 8 : i32
    %5 = arith.muli %4, %c8_i32 : i32
    %6 = tpu.iota {dimensions = array<i32: 0>} : vector<8x1xi32>
    %7 = vector.broadcast %5 : i32 to vector<8x1xi32>
    %8 = arith.addi %7, %6 : vector<8x1xi32>
    %c8_i32_1 = arith.constant 8 : i32
    %9 = vector.broadcast %c8_i32_1 : i32 to vector<8x1xi32>
    %10 = arith.cmpi slt, %8, %9 : vector<8x1xi32>
    %c0 = arith.constant 0 : index
    %c0_2 = arith.constant 0 : index
    %11 = vector.load %arg3[%c0, %c0_2] : memref<8x32xf32, #tpu.memory_space<vmem>>, vector<8x32xf32>
    %cst = arith.constant 0.000000e+00 : f32
    %12 = vector.shape_cast %10 : vector<8x1xi1> to vector<8x1xi1>
    %13 = vector.broadcast %12 : vector<8x1xi1> to vector<8x32xi1>
    %14 = vector.broadcast %cst : f32 to vector<8x32xf32>
    %15 = arith.select %13, %11, %14 : vector<8x32xi1>, vector<8x32xf32>
    %c0_3 = arith.constant 0 : index
    %c0_4 = arith.constant 0 : index
    %16 = vector.load %arg2[%c0_3, %c0_4] : memref<8x1xi32, #tpu.memory_space<vmem>>, vector<8x1xi32>
    %17 = tpu.iota {dimensions = array<i32: 1>} : vector<8x3xi32>
    %18 = vector.broadcast %16 : vector<8x1xi32> to vector<8x3xi32>
    %19 = arith.cmpi eq, %17, %18 : vector<8x3xi32>
    %20 = arith.extui %19 : vector<8x3xi1> to vector<8x3xi32>
    %21 = arith.sitofp %20 : vector<8x3xi32> to vector<8x3xf32>
    %c0_5 = arith.constant 0 : index
    %c0_6 = arith.constant 0 : index
    %22 = vector.load %arg6[%c0_5, %c0_6] : memref<3x32xf32, #tpu.memory_space<vmem>>, vector<3x32xf32>
    %cst_7 = arith.constant dense<0.000000e+00> : vector<3x32xf32>
    %23 = tpu.matmul %21, %15, %cst_7 {dimension_numbers = #tpu.dot_dimension_numbers<[0], [0], [1], [1], [0, 1, 1, 1], [], []>} : vector<8x3xf32>, vector<8x32xf32>, vector<3x32xf32> -> vector<3x32xf32>
    %24 = arith.addf %22, %23 : vector<3x32xf32>
    %c0_8 = arith.constant 0 : index
    %c0_9 = arith.constant 0 : index
    %25 = vector.load %arg6[%c0_8, %c0_9] : memref<3x32xf32, #tpu.memory_space<vmem>>, vector<3x32xf32>
    tpu.vector_store %arg6[%c0_8, %c0_9], %24 {strides = array<i32>} : memref<3x32xf32, #tpu.memory_space<vmem>>, vector<3x32xf32>,
    %c0_10 = arith.constant 0 : index
    %c0_11 = arith.constant 0 : index
    %26 = vector.load %arg7[%c0_10, %c0_11] : memref<3x32xf32, #tpu.memory_space<vmem>>, vector<3x32xf32>
    %27 = arith.mulf %15, %15 : vector<8x32xf32>
    %cst_12 = arith.constant dense<0.000000e+00> : vector<3x32xf32>
    %28 = tpu.matmul %21, %27, %cst_12 {dimension_numbers = #tpu.dot_dimension_numbers<[0], [0], [1], [1], [0, 1, 1, 1], [], []>} : vector<8x3xf32>, vector<8x32xf32>, vector<3x32xf32> -> vector<3x32xf32>
    %29 = arith.addf %26, %28 : vector<3x32xf32>
    %c0_13 = arith.constant 0 : index
    %c0_14 = arith.constant 0 : index
    %30 = vector.load %arg7[%c0_13, %c0_14] : memref<3x32xf32, #tpu.memory_space<vmem>>, vector<3x32xf32>
    tpu.vector_store %arg7[%c0_13, %c0_14], %29 {strides = array<i32>} : memref<3x32xf32, #tpu.memory_space<vmem>>, vector<3x32xf32>,
    %c0_i32_15 = arith.constant 0 : i32
    %31 = arith.cmpi eq, %arg1, %c0_i32_15 : i32
    %32 = arith.extui %31 : i1 to i32
    %c0_i32_16 = arith.constant 0 : i32
    %33 = arith.cmpi ne, %32, %c0_i32_16 : i32
    scf.if %33 {
      %c0_17 = arith.constant 0 : index
      %c0_18 = arith.constant 0 : index
      %34 = vector.load %arg6[%c0_17, %c0_18] : memref<3x32xf32, #tpu.memory_space<vmem>>, vector<3x32xf32>
      %c0_19 = arith.constant 0 : index
      %c0_20 = arith.constant 0 : index
      %c0_21 = arith.constant 0 : index
      %35 = vector.load %arg4[%c0_19, %c0_20, %c0_21] : memref<1x3x32xf32, #tpu.memory_space<vmem>>, vector<1x3x32xf32>
      %36 = vector.shape_cast %35 : vector<1x3x32xf32> to vector<3x32xf32>
      %37 = vector.shape_cast %34 : vector<3x32xf32> to vector<1x3x32xf32>
      tpu.vector_store %arg4[%c0_19, %c0_20, %c0_21], %37 {strides = array<i32>} : memref<1x3x32xf32, #tpu.memory_space<vmem>>, vector<1x3x32xf32>,
      %c0_22 = arith.constant 0 : index
      %c0_23 = arith.constant 0 : index
      %38 = vector.load %arg7[%c0_22, %c0_23] : memref<3x32xf32, #tpu.memory_space<vmem>>, vector<3x32xf32>
      %c0_24 = arith.constant 0 : index
      %c0_25 = arith.constant 0 : index
      %c0_26 = arith.constant 0 : index
      %39 = vector.load %arg5[%c0_24, %c0_25, %c0_26] : memref<1x3x32xf32, #tpu.memory_space<vmem>>, vector<1x3x32xf32>
      %40 = vector.shape_cast %39 : vector<1x3x32xf32> to vector<3x32xf32>
      %41 = vector.shape_cast %38 : vector<3x32xf32> to vector<1x3x32xf32>
      tpu.vector_store %arg5[%c0_24, %c0_25, %c0_26], %41 {strides = array<i32>} : memref<1x3x32xf32, #tpu.memory_space<vmem>>, vector<1x3x32xf32>,
    } else {
    }
    return
  }
  func.func @transform_0(%arg0: i32, %arg1: i32) -> (i32, i32) {
    %c1_i32 = arith.constant 1 : i32
    %0 = arith.muli %arg0, %c1_i32 : i32
    %1 = arith.addi %0, %arg1 : i32
    %c0_i32 = arith.constant 0 : i32
    %2 = arith.minsi %1, %c0_i32 : i32
    %c0_i32_0 = arith.constant 0 : i32
    %c0_i32_1 = arith.constant 0 : i32
    return %2, %c0_i32_0 : i32, i32
  }
  func.func @transform_1(%arg0: i32, %arg1: i32) -> (i32, i32) {
    %c1_i32 = arith.constant 1 : i32
    %0 = arith.muli %arg0, %c1_i32 : i32
    %1 = arith.addi %0, %arg1 : i32
    %c0_i32 = arith.constant 0 : i32
    %2 = arith.minsi %1, %c0_i32 : i32
    %c0_i32_0 = arith.constant 0 : i32
    %c0_i32_1 = arith.constant 0 : i32
    return %2, %c0_i32_0 : i32, i32
  }
  func.func @transform_2(%arg0: i32, %arg1: i32) -> (i32, i32, i32) {
    %c0_i32 = arith.constant 0 : i32
    %c0_i32_0 = arith.constant 0 : i32
    %c0_i32_1 = arith.constant 0 : i32
    return %arg0, %c0_i32, %c0_i32_0 : i32, i32, i32
  }
  func.func @transform_3(%arg0: i32, %arg1: i32) -> (i32, i32, i32) {
    %c0_i32 = arith.constant 0 : i32
    %c0_i32_0 = arith.constant 0 : i32
    %c0_i32_1 = arith.constant 0 : i32
    return %arg0, %c0_i32, %c0_i32_0 : i32, i32, i32
  }
}

</mosaic_0001>

<bundles_post_ra>
// kernel: tpu_custom_call.1
= control target key start
LH: loop header
LB: loop body
LE: loop exit
PB: predicated region body
PF: predicated region fallthrough
CT: control target
= control target key end

     0   :  { %v326_v0 = vmov 0   ;;  %v327_v2 = vmov 0.0   ;;  %vm328_vm0 = vmmov 0   ;;  %v86_v5 = vlaneseq  ;;  %s367_s0 = inlined_call_operand.vmem [shape: s32[8,1], index: 0, kind: input, shape index: {}]   ;;  %s368_s1 = inlined_call_operand.vmem [shape: f32[8,32], index: 1, kind: input, shape index: {}]   ;;  %s369_s2 = inlined_call_operand.vmem [shape: f32[1,3,32], index: 2, kind: output, shape index: {0}]   ;;  %s370_s3 = inlined_call_operand.vmem [shape: f32[1,3,32], index: 3, kind: output, shape index: {1}]  }
   0x1   :  { %325 = vset.pattern.permute.xlu0 %v326_v0  ;;  %v85_v1 = vld [vmem:[%s367_s0] sm:$0xff]  ;;  %312 = vmatprep.subr.mxu0 %v327_v2  ;;  %vm71_vm2 = vcmask 256000   ;;  %vm127_vm3 = vcmask 64512  }
   0x2   :  { %89 = vperm.xlu0 %325, %v85_v1   ;;  %317 = vmatprep.subr.mxu1 %v327_v2  ;;  %v81_v3 = vld [vmem:[%s368_s1] sm:$0xff]  ;;  %v87_v6 = vand.u32 127, %v86_v5  ;;  %72 = vst.msk [vmem:[#allocation2] sm:$0x7] %vm71_vm2, %v327_v2  ;;  %73 = vst.msk [vmem:[#allocation3] sm:$0x7] %vm71_vm2, %v327_v2 }
   0x3   :  { %314 = vmatprep.mubr.msk.f32.mxu0 %vm328_vm0, %v327_v2  ;;  %319 = vmatprep.mubr.msk.f32.mxu1 %vm328_vm0, %v327_v2  ;;  %v205_v4 = vmul.f32 %v81_v3, %v81_v3 }
   0x4   :  { %313 = vmatpush3.msra.mxu0 %v81_v3 }
   0x5   :  { %318 = vmatpush3.msra.mxu1 %v205_v4 }
   0x9   :  { %v94_v10 = vld [vmem:[#allocation2] sm:$0x7]  ;;  %v204_v11 = vld [vmem:[#allocation3] sm:$0x7] }
  0x81   :  { %v90_v7 = vpop.permute.xlu0 %89 }
  0x82   :  { %vm91_vm1 = vcmp.eq.s32.totalorder %v87_v6, %v90_v7 }
  0x83   :  { %v305_v8 = vsel %vm91_vm1, 1.0, %v327_v2 }
  0x84   :  { %95 = vxpose.xlu0.b32.start.end [1/1] (short) (narrow) %v305_v8, 8 }
 0x104   :  { %v111_v9 = vpop.trf.xlu0 }
 0x105   :  { %315 = vmatmul.mubr.msk.f32.vlgmr.msra.gmra.mrb[0].mxu0 %vm127_vm3, %v111_v9  ;;  %320 = vmatmul.mubr.msk.f32.vlgmr.msra.gmra.mrb[0].mxu1 %vm127_vm3, %v111_v9 }
 0x1d8   :  { %v197_v12 = vpop.f32.mrb[0].mxu0  ;;  %v272_v13 = vpop.f32.mrb[0].mxu1 }
 0x1d9   :  { %v201_v14 = vadd.f32 %v197_v12, %v94_v10  ;;  %v276_v15 = vadd.f32 %v272_v13, %v204_v11  ;;  %v316_v16 = vpop.f32.mrb[1].mxu0  ;;  %v321_v17 = vpop.f32.mrb[1].mxu1 }
 0x1db   :  { %203 = vst.msk [vmem:[#allocation2] sm:$0x7] %vm71_vm2, %v201_v14  ;;  %277 = vst.msk [vmem:[#allocation3] sm:$0x7] %vm71_vm2, %v276_v15 }
 0x1e2   :  { %v281_v18 = vld [vmem:[#allocation2] sm:$0x7]  ;;  %v283_v19 = vld [vmem:[#allocation3] sm:$0x7] }
 0x1e3   :  { %282 = vst.msk [vmem:[%s369_s2] sm:$0x7] %vm71_vm2, %v281_v18  ;;  %284 = vst.msk [vmem:[%s370_s3] sm:$0x7] %vm71_vm2, %v283_v19 }

</bundles_post_ra>
